<compile_context>
chip_gen: v7x
topology: tpu7x:2x2x1
jax: 0.10.0
libtpu: 0.0.40
codegen_flags: <defaults>
</compile_context>

<pallas_src>
import jax
import jax.numpy as jnp
from jax.experimental import pallas as pl
from jax.experimental.pallas import tpu as pltpu


def ffn_kernel(x_ref, w1_ref, b1_ref, w2_ref, b2_ref, w3_ref, b3_ref,
               o_ref, h1_ref, acc_ref):
    """One (row-tile i, d_ff-chunk j) grid step."""
    j = pl.program_id(1)

    @pl.when(j == 0)
    def _():
        # linear1 + relu (dropout == identity in eval mode), computed once per
        # row tile and kept resident in VMEM for all d_ff chunks.
        x = x_ref[...].astype(jnp.bfloat16)
        h1 = jnp.dot(x, w1_ref[...], preferred_element_type=jnp.float32) + b1_ref[...]
        h1_ref[...] = jnp.maximum(h1, 0.0).astype(jnp.bfloat16)
        acc_ref[...] = jnp.zeros_like(acc_ref)

    # linear2 on chunk j of d_ff (dropout == identity), then its contribution
    # to linear3, accumulated in f32.
    h2_j = jnp.dot(h1_ref[...], w2_ref[...], preferred_element_type=jnp.float32) + b2_ref[...]
    h2_j = h2_j.astype(jnp.bfloat16)
    acc_ref[...] += jnp.dot(h2_j, w3_ref[...], preferred_element_type=jnp.float32)

    @pl.when(j == pl.num_programs(1) - 1)
    def _():
        o_ref[...] = (acc_ref[...] + b3_ref[...]).astype(o_ref.dtype)


def _round_up(a, b):
    return ((a + b - 1) // b) * b


def _pick_tn(d_ff, target=512):
    """d_ff chunk width: full d_ff if small, else a multiple-of-128 divisor."""
    if d_ff <= target:
        return d_ff
    for cand in (512, 384, 256, 128):
        if d_ff % cand == 0:
            return cand
    # TODO(synk): d_ff > 512 and not a multiple of 128 -> keep full d_ff
    # resident (no inner tiling) rather than padding the reduction dim.
    return d_ff


def _vmem_limit_bytes(needed_bytes):
    """Generation-aware VMEM limit: budget + headroom, clamped to ~3/4 of
    physical VMEM (~48 MiB on v7x, ~96 MiB on v5e/v6e)."""
    try:
        cap = pltpu.get_tpu_info().vmem_capacity_bytes
    except Exception:
        cap = 64 * 1024 * 1024  # conservative (v7x per-TC)
    limit = min(needed_bytes + 8 * 1024 * 1024, int(0.75 * cap))
    return int(max(limit, 16 * 1024 * 1024))


def feed_forward_block(x, params, *, tm=256, tn=None):
    """x: [batch, seq, d_model] (f32 or bf16) -> [batch, seq, d_model]."""
    w1, b1, w2, b2, w3, b3 = params
    B, S, d_model = x.shape
    d_ff = w1.shape[1]
    M = B * S

    # Row tile: MXU-sized by default, shrunk (multiple of 8) for small inputs.
    tm_eff = min(tm, _round_up(M, 8))
    # Ensure >= 2 row steps when possible so "parallel" splits across both
    # TensorCores on v7x.
    if pl.cdiv(M, tm_eff) < 2 and tm_eff > 8:
        tm_eff = _round_up(pl.cdiv(tm_eff, 2), 8)
    M_pad = pl.cdiv(M, tm_eff) * tm_eff

    x2d = x.reshape(M, d_model)
    if M_pad != M:
        x2d = jnp.pad(x2d, ((0, M_pad - M), (0, 0)))

    # d_ff chunk width for the reduction axis.
    tn_eff = tn if tn is not None else _pick_tn(d_ff)
    assert d_ff % tn_eff == 0, "tn must divide d_ff"
    n_j = d_ff // tn_eff

    # Weights in bf16 (MXU-native, half DMA/VMEM); biases stay f32 (added
    # after f32 accumulation), reshaped to (1, N) for 2-D VMEM layout.
    w1b = w1.astype(jnp.bfloat16)
    w2b = w2.astype(jnp.bfloat16)
    w3b = w3.astype(jnp.bfloat16)
    b1r = b1.reshape(1, d_ff).astype(jnp.float32)
    b2r = b2.reshape(1, d_ff).astype(jnp.float32)
    b3r = b3.reshape(1, d_model).astype(jnp.float32)

    grid = (M_pad // tm_eff, n_j)
    n_row_tiles = grid[0]

    # Resident VMEM budget (bytes): double-buffered streamed tiles + single-
    # buffered constants + scratch.
    xsz = x2d.dtype.itemsize
    vmem_needed = (
        tm_eff * d_model * xsz * 2          # x tile (2 bufs)
        + tm_eff * d_model * xsz * 2        # out tile (2 bufs)
        + d_model * d_ff * 2                # W1 bf16 (single-buffered)
        + 8 * d_ff * 4                      # b1 (sublane-padded)
        + d_ff * tn_eff * 2 * 2             # W2 chunk (2 bufs)
        + 8 * tn_eff * 4 * 2                # b2 chunk (2 bufs)
        + tn_eff * d_model * 2 * 2          # W3 chunk (2 bufs)
        + 8 * d_model * 4                   # b3 (single-buffered)
        + tm_eff * d_ff * 2                 # h1 scratch (bf16)
        + tm_eff * d_model * 4              # acc scratch (f32)
    )

    flops = 2 * M_pad * (d_model * d_ff + d_ff * d_ff + d_ff * d_model)
    weight_stream = w1b.size * 2 + (w2b.size + w3b.size) * 2 * (n_row_tiles if n_j > 1 else 1)
    bytes_accessed = (
        M_pad * d_model * xsz * 2
        + weight_stream
        + (b1r.size + b2r.size + b3r.size) * 4
    )

    out2d = pl.pallas_call(
        ffn_kernel,
        out_shape=jax.ShapeDtypeStruct((M_pad, d_model), x.dtype),
        grid_spec=pltpu.PrefetchScalarGridSpec(
            num_scalar_prefetch=0,
            grid=grid,
            in_specs=[
                # row tile of the input
                pl.BlockSpec((tm_eff, d_model), lambda i, j: (i, 0)),
                # W1, b1: constant index -> single-buffered residents
                pl.BlockSpec((d_model, d_ff), lambda i, j: (0, 0),
                             pipeline_mode=pl.Buffered(1)),
                pl.BlockSpec((1, d_ff), lambda i, j: (0, 0),
                             pipeline_mode=pl.Buffered(1)),
                # W2 column slab / b2 slab / W3 row slab: streamed over j
                pl.BlockSpec((d_ff, tn_eff), lambda i, j: (0, j)),
                pl.BlockSpec((1, tn_eff), lambda i, j: (0, j)),
                pl.BlockSpec((tn_eff, d_model), lambda i, j: (j, 0)),
                # b3: constant
                pl.BlockSpec((1, d_model), lambda i, j: (0, 0),
                             pipeline_mode=pl.Buffered(1)),
            ],
            out_specs=pl.BlockSpec((tm_eff, d_model), lambda i, j: (i, 0)),
            scratch_shapes=[
                pltpu.VMEM((tm_eff, d_ff), jnp.bfloat16),    # h1
                pltpu.VMEM((tm_eff, d_model), jnp.float32),  # out accumulator
            ],
        ),
        compiler_params=pltpu.CompilerParams(
            dimension_semantics=("parallel", "arbitrary"),
            vmem_limit_bytes=_vmem_limit_bytes(vmem_needed),
        ),
        cost_estimate=pl.CostEstimate(
            flops=flops, transcendentals=0, bytes_accessed=bytes_accessed),
    )(x2d, w1b, b1r, w2b, b2r, w3b, b3r)

    if M_pad != M:
        out2d = out2d[:M]
    return out2d.reshape(B, S, d_model)


def init_params(key, d_model, d_ff, dtype=jnp.float32):
    """Deterministic init mimicking nn.Linear's uniform(-1/sqrt(fan_in), +)."""
    ks = jax.random.split(key, 6)

    def lin(kw, kb, fan_in, fan_out):
        bound = 1.0 / (fan_in ** 0.5)
        w = jax.random.uniform(kw, (fan_in, fan_out), dtype, -bound, bound)
        b = jax.random.uniform(kb, (fan_out,), dtype, -bound, bound)
        return w, b

    w1, b1 = lin(ks[0], ks[1], d_model, d_ff)
    w2, b2 = lin(ks[2], ks[3], d_ff, d_ff)
    w3, b3 = lin(ks[4], ks[5], d_ff, d_model)
    return (w1, b1, w2, b2, w3, b3)


def feed_forward_ref(x, params):
    """Plain-JAX f32 reference (eval-mode dropout = identity)."""
    w1, b1, w2, b2, w3, b3 = params
    h1 = jnp.maximum(x @ w1 + b1, 0.0)
    h2 = h1 @ w2 + b2
    return h2 @ w3 + b3


if __name__ == "__main__":
    key = jax.random.PRNGKey(0)
    kx, kp1, kp2 = jax.random.split(key, 3)

    # Test 1: small shapes, single d_ff chunk.
    batch, seq, d_model, d_ff = 2, 8, 32, 64
    x = jax.random.normal(kx, (batch, seq, d_model), dtype=jnp.float32)
    params = init_params(kp1, d_model, d_ff)

    out = feed_forward_block(x, params)
    out = jax.block_until_ready(out)
    ref = feed_forward_ref(x, params)
    assert out.shape == (batch, seq, d_model)
    # bf16 matmul inputs with f32 accumulation -> small deviation vs f32 ref.
    assert jnp.allclose(out, ref, atol=5e-2, rtol=5e-2), "mismatch vs reference (test 1)"

    # Test 2: exercise the d_ff reduction axis (2 chunks) and the accumulator.
    d_ff2 = 256
    params2 = init_params(kp2, d_model, d_ff2)
    out2 = feed_forward_block(x, params2, tn=128)
    out2 = jax.block_until_ready(out2)
    ref2 = feed_forward_ref(x, params2)
    assert jnp.allclose(out2, ref2, atol=5e-2, rtol=5e-2), "mismatch vs reference (test 2)"

    print("KERNEL_OK")
</pallas_src>

<mosaic_0001>
module attributes {stable_mosaic.version = 11 : i64} {
  func.func @ffn_kernel(%arg0: i32, %arg1: i32, %arg2: memref<8x32xf32, #tpu.memory_space<vmem>>, %arg3: memref<32x64xbf16, #tpu.memory_space<vmem>>, %arg4: memref<1x64xf32, #tpu.memory_space<vmem>>, %arg5: memref<64x64xbf16, #tpu.memory_space<vmem>>, %arg6: memref<1x64xf32, #tpu.memory_space<vmem>>, %arg7: memref<64x32xbf16, #tpu.memory_space<vmem>>, %arg8: memref<1x32xf32, #tpu.memory_space<vmem>>, %arg9: memref<8x32xf32, #tpu.memory_space<vmem>>, %arg10: memref<8x64xbf16, #tpu.memory_space<vmem>>, %arg11: memref<8x32xf32, #tpu.memory_space<vmem>>) attributes {dimension_semantics = [#tpu.dimension_semantics<parallel>, #tpu.dimension_semantics<arbitrary>], iteration_bounds = array<i64: 2, 1>, scalar_prefetch = 0 : i64, scratch_operands = 2 : i64, tpu.core_type = #tpu.core_type<tc>, window_params = [{transform_indices = @transform_0, window_bounds = array<i64: 8, 32>}, {pipeline_mode = #tpu.pipeline_mode<synchronous>, transform_indices = @transform_1, window_bounds = array<i64: 32, 64>}, {pipeline_mode = #tpu.pipeline_mode<synchronous>, transform_indices = @transform_2, window_bounds = array<i64: 1, 64>}, {transform_indices = @transform_3, window_bounds = array<i64: 64, 64>}, {transform_indices = @transform_4, window_bounds = array<i64: 1, 64>}, {transform_indices = @transform_5, window_bounds = array<i64: 64, 32>}, {pipeline_mode = #tpu.pipeline_mode<synchronous>, transform_indices = @transform_6, window_bounds = array<i64: 1, 32>}, {transform_indices = @transform_7, window_bounds = array<i64: 8, 32>}]} {
    %c0_i32 = arith.constant 0 : i32
    %0 = arith.cmpi eq, %arg1, %c0_i32 : i32
    %1 = arith.extui %0 : i1 to i32
    %c0_i32_0 = arith.constant 0 : i32
    %2 = arith.cmpi ne, %1, %c0_i32_0 : i32
    scf.if %2 {
      %c0_15 = arith.constant 0 : index
      %c0_16 = arith.constant 0 : index
      %18 = vector.load %arg2[%c0_15, %c0_16] : memref<8x32xf32, #tpu.memory_space<vmem>>, vector<8x32xf32>
      %19 = arith.truncf %18 : vector<8x32xf32> to vector<8x32xbf16>
      %c0_17 = arith.constant 0 : index
      %c0_18 = arith.constant 0 : index
      %20 = vector.load %arg3[%c0_17, %c0_18] : memref<32x64xbf16, #tpu.memory_space<vmem>>, vector<32x64xbf16>
      %cst_19 = arith.constant dense<0.000000e+00> : vector<8x64xf32>
      %21 = tpu.matmul %19, %20, %cst_19 {dimension_numbers = #tpu.dot_dimension_numbers<[1], [0], [0], [1], [0, 0, 1, 1], [], []>} : vector<8x32xbf16>, vector<32x64xbf16>, vector<8x64xf32> -> vector<8x64xf32>
      %c0_20 = arith.constant 0 : index
      %c0_21 = arith.constant 0 : index
      %22 = vector.load %arg4[%c0_20, %c0_21] : memref<1x64xf32, #tpu.memory_space<vmem>>, vector<1x64xf32>
      %23 = vector.broadcast %22 : vector<1x64xf32> to vector<8x64xf32>
      %24 = arith.addf %21, %23 : vector<8x64xf32>
      %cst_22 = arith.constant 0.000000e+00 : f32
      %25 = vector.broadcast %cst_22 : f32 to vector<8x64xf32>
      %26 = arith.maximumf %24, %25 : vector<8x64xf32>
      %27 = arith.truncf %26 : vector<8x64xf32> to vector<8x64xbf16>
      %c0_23 = arith.constant 0 : index
      %c0_24 = arith.constant 0 : index
      %28 = vector.load %arg10[%c0_23, %c0_24] : memref<8x64xbf16, #tpu.memory_space<vmem>>, vector<8x64xbf16>
      tpu.vector_store %arg10[%c0_23, %c0_24], %27 {strides = array<i32>} : memref<8x64xbf16, #tpu.memory_space<vmem>>, vector<8x64xbf16>,
      %cst_25 = arith.constant 0.000000e+00 : f32
      %29 = vector.broadcast %cst_25 : f32 to vector<8x32xf32>
      %c0_26 = arith.constant 0 : index
      %c0_27 = arith.constant 0 : index
      %30 = vector.load %arg11[%c0_26, %c0_27] : memref<8x32xf32, #tpu.memory_space<vmem>>, vector<8x32xf32>
      tpu.vector_store %arg11[%c0_26, %c0_27], %29 {strides = array<i32>} : memref<8x32xf32, #tpu.memory_space<vmem>>, vector<8x32xf32>,
    } else {
    }
    %c0 = arith.constant 0 : index
    %c0_1 = arith.constant 0 : index
    %3 = vector.load %arg10[%c0, %c0_1] : memref<8x64xbf16, #tpu.memory_space<vmem>>, vector<8x64xbf16>
    %c0_2 = arith.constant 0 : index
    %c0_3 = arith.constant 0 : index
    %4 = vector.load %arg5[%c0_2, %c0_3] : memref<64x64xbf16, #tpu.memory_space<vmem>>, vector<64x64xbf16>
    %cst = arith.constant dense<0.000000e+00> : vector<8x64xf32>
    %5 = tpu.matmul %3, %4, %cst {dimension_numbers = #tpu.dot_dimension_numbers<[1], [0], [0], [1], [0, 0, 1, 1], [], []>} : vector<8x64xbf16>, vector<64x64xbf16>, vector<8x64xf32> -> vector<8x64xf32>
    %c0_4 = arith.constant 0 : index
    %c0_5 = arith.constant 0 : index
    %6 = vector.load %arg6[%c0_4, %c0_5] : memref<1x64xf32, #tpu.memory_space<vmem>>, vector<1x64xf32>
    %7 = vector.broadcast %6 : vector<1x64xf32> to vector<8x64xf32>
    %8 = arith.addf %5, %7 : vector<8x64xf32>
    %9 = arith.truncf %8 : vector<8x64xf32> to vector<8x64xbf16>
    %c0_6 = arith.constant 0 : index
    %c0_7 = arith.constant 0 : index
    %10 = vector.load %arg11[%c0_6, %c0_7] : memref<8x32xf32, #tpu.memory_space<vmem>>, vector<8x32xf32>
    %c0_8 = arith.constant 0 : index
    %c0_9 = arith.constant 0 : index
    %11 = vector.load %arg7[%c0_8, %c0_9] : memref<64x32xbf16, #tpu.memory_space<vmem>>, vector<64x32xbf16>
    %cst_10 = arith.constant dense<0.000000e+00> : vector<8x32xf32>
    %12 = tpu.matmul %9, %11, %cst_10 {dimension_numbers = #tpu.dot_dimension_numbers<[1], [0], [0], [1], [0, 0, 1, 1], [], []>} : vector<8x64xbf16>, vector<64x32xbf16>, vector<8x32xf32> -> vector<8x32xf32>
    %13 = arith.addf %10, %12 : vector<8x32xf32>
    %c0_11 = arith.constant 0 : index
    %c0_12 = arith.constant 0 : index
    %14 = vector.load %arg11[%c0_11, %c0_12] : memref<8x32xf32, #tpu.memory_space<vmem>>, vector<8x32xf32>
    tpu.vector_store %arg11[%c0_11, %c0_12], %13 {strides = array<i32>} : memref<8x32xf32, #tpu.memory_space<vmem>>, vector<8x32xf32>,
    %c0_i32_13 = arith.constant 0 : i32
    %15 = arith.cmpi eq, %arg1, %c0_i32_13 : i32
    %16 = arith.extui %15 : i1 to i32
    %c0_i32_14 = arith.constant 0 : i32
    %17 = arith.cmpi ne, %16, %c0_i32_14 : i32
    scf.if %17 {
      %c0_15 = arith.constant 0 : index
      %c0_16 = arith.constant 0 : index
      %18 = vector.load %arg11[%c0_15, %c0_16] : memref<8x32xf32, #tpu.memory_space<vmem>>, vector<8x32xf32>
      %c0_17 = arith.constant 0 : index
      %c0_18 = arith.constant 0 : index
      %19 = vector.load %arg8[%c0_17, %c0_18] : memref<1x32xf32, #tpu.memory_space<vmem>>, vector<1x32xf32>
      %20 = vector.broadcast %19 : vector<1x32xf32> to vector<8x32xf32>
      %21 = arith.addf %18, %20 : vector<8x32xf32>
      %c0_19 = arith.constant 0 : index
      %c0_20 = arith.constant 0 : index
      %22 = vector.load %arg9[%c0_19, %c0_20] : memref<8x32xf32, #tpu.memory_space<vmem>>, vector<8x32xf32>
      tpu.vector_store %arg9[%c0_19, %c0_20], %21 {strides = array<i32>} : memref<8x32xf32, #tpu.memory_space<vmem>>, vector<8x32xf32>,
    } else {
    }
    return
  }
  func.func @transform_0(%arg0: i32, %arg1: i32) -> (i32, i32) {
    %c0_i32 = arith.constant 0 : i32
    %c0_i32_0 = arith.constant 0 : i32
    return %arg0, %c0_i32 : i32, i32
  }
  func.func @transform_1(%arg0: i32, %arg1: i32) -> (i32, i32) {
    %c0_i32 = arith.constant 0 : i32
    %c0_i32_0 = arith.constant 0 : i32
    %c0_i32_1 = arith.constant 0 : i32
    return %c0_i32, %c0_i32_0 : i32, i32
  }
  func.func @transform_2(%arg0: i32, %arg1: i32) -> (i32, i32) {
    %c0_i32 = arith.constant 0 : i32
    %c0_i32_0 = arith.constant 0 : i32
    %c0_i32_1 = arith.constant 0 : i32
    return %c0_i32, %c0_i32_0 : i32, i32
  }
  func.func @transform_3(%arg0: i32, %arg1: i32) -> (i32, i32) {
    %c0_i32 = arith.constant 0 : i32
    %c0_i32_0 = arith.constant 0 : i32
    return %c0_i32, %arg1 : i32, i32
  }
  func.func @transform_4(%arg0: i32, %arg1: i32) -> (i32, i32) {
    %c0_i32 = arith.constant 0 : i32
    %c0_i32_0 = arith.constant 0 : i32
    return %c0_i32, %arg1 : i32, i32
  }
  func.func @transform_5(%arg0: i32, %arg1: i32) -> (i32, i32) {
    %c0_i32 = arith.constant 0 : i32
    %c0_i32_0 = arith.constant 0 : i32
    return %arg1, %c0_i32 : i32, i32
  }
  func.func @transform_6(%arg0: i32, %arg1: i32) -> (i32, i32) {
    %c0_i32 = arith.constant 0 : i32
    %c0_i32_0 = arith.constant 0 : i32
    %c0_i32_1 = arith.constant 0 : i32
    return %c0_i32, %c0_i32_0 : i32, i32
  }
  func.func @transform_7(%arg0: i32, %arg1: i32) -> (i32, i32) {
    %c0_i32 = arith.constant 0 : i32
    %c0_i32_0 = arith.constant 0 : i32
    return %arg0, %c0_i32 : i32, i32
  }
}

</mosaic_0001>

<bundles_post_ra>
// kernel: tpu_custom_call.1
= control target key start
LH: loop header
LB: loop body
LE: loop exit
PB: predicated region body
PF: predicated region fallthrough
CT: control target
= control target key end

     0   :  { %12 = vsyncpa [#allocation5], 0  ;;  %s1250_s0 = inlined_call_operand.vmem [shape: f32[16,32], index: 0, kind: input, shape index: {}]   ;;  %s1251_s1 = inlined_call_operand.hbm [shape: bf16[32,64], index: 1, kind: input, shape index: {}]   ;;  %s1252_s2 = inlined_call_operand.vmem [shape: f32[1,64], index: 2, kind: input, shape index: {}]   ;;  %s1253_s3 = inlined_call_operand.vmem [shape: bf16[64,64], index: 3, kind: input, shape index: {}]   ;;  %s1254_s4 = inlined_call_operand.vmem [shape: f32[1,64], index: 4, kind: input, shape index: {}]   ;;  %s1255_s5 = inlined_call_operand.vmem [shape: bf16[64,32], index: 5, kind: input, shape index: {}]   ;;  %s1256_s6 = inlined_call_operand.vmem [shape: f32[1,32], index: 6, kind: input, shape index: {}]   ;;  %s1257_s7 = inlined_call_operand.hbm [shape: f32[16,32], index: 7, kind: output, shape index: {}]  }
   0x1   :  { %13 = vsyncpa [#allocation6], 0 }
   0x2   :  { %15 = vsyncpa [#allocation6 + $0x1], 0  ;;  %s1060_s24 = smov 0   ;;  %s1062_s25 = smov 0  }
   0x3   :  { %s1064_s26 = smov 0   ;;  %s1066_s27 = smov 0  }
   0x4   :  { %s1068_s28 = smov 0   ;;  %s1070_s29 = smov 0  }
   0x5 LB: > { %s745_s30 = sadd.s32 4294967295, %s1012_s29   ;;  %s746_s8 = sadd.s32 4294967294, %s1012_s29   ;;  %s1012_s29 = sphi %s1070_s29, %s21_s29   ;;  %s1008_s28 = sphi %s1068_s28, %s1275_s28   ;;  %s1004_s27 = sphi %s1066_s27, %s1274_s27   ;;  %s1000_s26 = sphi %s1064_s26, %s1273_s26   ;;  %s996_s25 = sphi %s1062_s25, %s1272_s25   ;;  %s992_s24 = sphi %s1060_s24, %s1271_s24  }
   0x6   : > { %s33_s9 = sadd.s32 1, %s1008_s28  ;;  %s207_s10 = sadd.s32 1, %s1000_s26 }
   0x7   : > { %p35_p0 = scmp.ge.s32.totalorder %s33_s9, 2  ;;  %p217_p1 = scmp.ne.s32.totalorder %s1000_s26, %s996_s25 }
   0x8   : > { %p218_p2 = scmp.eq.s32.totalorder %s745_s30, 1  ;;  %p223_p3 = scmp.ne.s32.totalorder %s996_s25, %s992_s24 }
   0x9   : > { %s1277_s9 = smov (%p35_p0, %s33_s9), 0  ;;  %p224_p5 = scmp.eq.s32.totalorder %s746_s8, 1 }
   0xa   : > { %p1100_p4 = por %p218_p2, %p217_p1  ;;  %s204_s12 = ssub.s32 %s1008_s28, %s1277_s9 }
   0xb   : > { %p747_p6 = scmp.ge.s32.totalorder %s1012_s29, 1  ;;  %p205_p7 = scmp.eq.s32.totalorder %s204_s12, 0 }
   0xc   : > { %s1262_s11 = scalar_select %p1100_p4, 1, 0 }
   0xd   : > { %p1107_p8 = por %p224_p5, %p223_p3  ;;  %p231_p9 = scmp.lt.s32.totalorder %s1012_s29, 3 }
   0xe   : > { %s1113_s14 = scalar_select %p205_p7, %s1000_s26, %s207_s10  }
   0xf   : > { %s1263_s13 = scalar_select %p1107_p8, 1, 0 }
  0x10   : > { %p1115_p10 = pnand %p747_p6, %p231_p9  ;;  %p1119_p11 = scmp.eq.s32.totalorder %s745_s30, 0 }
  0x11   : > { %s1014_s17 = smov [#allocation4]   ;;  %s902_s22 = scalar_lea.hbm %s1251_s1, 256 }
  0x12   : > { %s1264_s15 = scalar_select %p1115_p10, 1, 0 }
  0x13   : > { %s1265_s16 = scalar_select %p1119_p11, 1, 0 }
  0x14   : > { %p828_p12 = pneg %p1115_p10  ;;  %s243_s18 = sshll.u32 %s1014_s17, 4  ;;  %s244_s18 = int_to_ptr.vmem [resolvable:$true] %s243_s18 }
  0x15   : > { %p903_p0 = scmp.ne.s32.totalorder %s1251_s1, %s902_s22  ;;  %p909_p5 = scmp.lt.u32.totalorder %s902_s22, %s1251_s1 }
  0x16   : > { %p1127_p13 = pnand %p1119_p11, %p828_p12 }
  0x18   : > { %p904_p1 = pneg %p1127_p13 }
  0x1a   : > { %p905_p2 = pnand %p904_p1, %p903_p0 }
  0x1c   : > { %p906_p3 = pneg %p905_p2 }
  0x1e   : > { %p911_p6 = pnand %p909_p5, %p906_p3 }
  0x20   : > { %914 = shalt.err (!%p911_p6)
}
  0x21   : > { %s915_s12 = scalar_lea.vmem %s244_s18, 256  ;;  %p923_p8 = scmp.lt.s32.totalorder %s244_s18, %s244_s18 }
  0x22   : > { %p916_p7 = scmp.ne.s32.totalorder %s244_s18, %s915_s12  ;;  %p924_p4 = scmp.lt.s32.totalorder %s915_s12, %s915_s12 }
  0x24   : > { %p918_p9 = pnand %p916_p7, %p904_p1  ;;  %p925_p11 = por %p924_p4, %p923_p8 }
  0x26   : > { %p919_p12 = pneg %p918_p9 }
  0x28   : > { %p926_p10 = pnand %p925_p11, %p919_p12 }
  0x2a   : > { %929 = shalt.err (!%p926_p10)
}
  0x2b   : > { %s1015_s17 = smov 64   ;;  %s1016_s20 = smov 4  }
  0x2c   : > { %831 = dma.hbm_to_vmem [thread:$0]  (!%p1127_p13), %s1251_s1, 256, %s244_s18, [#allocation5], %s1015_s17, %s1015_s17, %s1016_s20  }
  0x2d   : > { %p1267_p0 = scmp.ne.s32.totalorder %s1264_s15, 0 }
  0x2e   : > { %p1268_p2 = scmp.ne.s32.totalorder (!%p1267_p0), %s1265_s16, 0 }
  0x2f   : > { %294 = sbr.rel (%p1267_p0) target bundleno = 745 (0x2e9), region = 48 }
  0x36   : > { %983 = dma.done.wait (%p1268_p2), [#allocation5], 256  }
  0x37   : > { %985 = vsyncadd (%p1268_p2), [#allocation5], 4294967040  ;;  %p337_p4 = scmp.lt.s32.totalorder %s1004_s27, 1  ;;  %vm384_vm0 = vcmask 261120   ;;  %v1017_v0 = vmov 0.0   ;;  %vm1018_vm1 = vmmov 0  }
  0x38   : > { %790 = vmatprep.subr.bf16.mxu0 %v1017_v0  ;;  %794 = vmatprep.mubr.msk.bf16.mxu0 %vm1018_vm1, %v1017_v0  ;;  %432 = vst.msk [vmem:[#allocation3] sm:$0xff] %vm384_vm0, %v1017_v0  ;;  %v892_v1 = vld [vmem:[#allocation4] sm:$0xff]   ;;  %v893_v2 = vld [vmem:[#allocation4 + $0x8] sm:$0xff]   ;;  %v894_v5 = vld [vmem:[%s1253_s3] sm:$0xff]   ;;  %vm430_vm2 = vcmask 519168   ;;  %vm473_vm3 = vcmask 523264  }
  0x39   : > { %s338_s18 = scalar_select %p337_p4, %s1004_s27, 1  ;;  %798 = vmatprep.subr.bf16.mxu1 %v1017_v0  ;;  %806 = vmatprep.mubr.msk.bf16.mxu1 %vm1018_vm1, %v1017_v0  ;;  %v895_v6 = vld [vmem:[%s1253_s3 + $0x8] sm:$0xff]   ;;  %v896_v7 = vld [vmem:[%s1253_s3 + $0x10] sm:$0xff]   ;;  %v897_v8 = vld [vmem:[%s1253_s3 + $0x18] sm:$0xff]  }
  0x3a   : > { %791 = vmatpush3.bf16.msra.mxu0 %v892_v1  ;;  %799 = vmatpush3.bf16.msra.mxu1 %v894_v5  ;;  %v898_v9 = vld [vmem:[%s1255_s5] sm:$0xff]   ;;  %v899_v10 = vld [vmem:[%s1255_s5 + $0x8] sm:$0xff]   ;;  %v900_v11 = vld [vmem:[%s1255_s5 + $0x10] sm:$0xff]   ;;  %s334_s23 = sand.u32 1, %s996_s25   ;;  %s774_s22 = sshll.u32 %s1004_s27, 7 }
  0x3b   : > { %s756_s15 = sshll.u32 %s338_s18, 3  ;;  %792 = vmatprep.subr.bf16.mxu0 %v1017_v0  ;;  %800 = vmatprep.subr.bf16.mxu1 %v1017_v0  ;;  %v757_v12 = vld [vmem:[%s1252_s2] ss:$0 sm:$0xff]  ;;  %v901_v21 = vld [vmem:[%s1255_s5 + $0x18] sm:$0xff]   ;;  %s755_s18 = sshll.u32 %s334_s23, 3 }
  0x3c   : > { %s340_s16 = scalar_lea.vmem %s1250_s0, %s756_s15  ;;  %v761_v22 = vld [vmem:[%s1254_s4] ss:$0 sm:$0xff]  ;;  %s1202_s12 = scalar_lea.hbm %s1257_s7, %s774_s22 }
  0x3d   : > { %v359_v3 = vld [vmem:[%s340_s16] sm:$0xff]  ;;  %s336_s16 = scalar_lea.vmem [#allocation7], %s755_s18  ;;  %s611_s17 = scalar_lea.sflag [#allocation6], %s334_s23 }
  0x3e   : > { %v360_v4 = vpack.c.bf16 %v359_v3, %v359_v3  ;;  %793 = vmatpush3.bf16.msra.mxu0 %v893_v2  ;;  %801 = vmatpush3.bf16.msra.mxu1 %v895_v6  ;;  %v772_v35 = vld [vmem:[%s1256_s6] ss:$0 sm:$0xff]  ;;  %s624_s30 = sshll.u32 %s336_s16, 4  ;;  %p1269_p10 = scmp.ne.s32.totalorder %s1262_s11, 0  ;;  %s1204_s30 = int_to_ptr.vmem [resolvable:$true] %s624_s30 }
  0x3f   : > { %810 = vmatprep.subr.bf16.mxu0 %v1017_v0  ;;  %802 = vmatprep.subr.bf16.mxu1 %v1017_v0  ;;  %v518_v29 = vld [vmem:[#allocation3] sm:$0xff]  ;;  %s930_s20 = scalar_lea.vmem %s1204_s30, 128  ;;  %s1019_s27 = smov [#allocation7]  }
  0x40   : > { %p931_p8 = scmp.ne.s32.totalorder %s1204_s30, %s930_s20  ;;  %s934_s21 = sshll.u32 %s1019_s27, 4  ;;  %s935_s21 = int_to_ptr.vmem [resolvable:$false] %s934_s21 }
  0x41   : > { %795 = vmatmul.mubr.msk.bf16.vlgmr.msra.gmra.mrb[0].mxu0 %vm384_vm0, %v360_v4  ;;  %s936_s18 = scalar_lea.vmem %s935_s21, 256  ;;  %p937_p1 = scmp.lt.s32.totalorder %s1204_s30, %s935_s21 }
  0x42   : > { %818 = vmatprep.mubr.msk.bf16.mxu0 %vm1018_vm1, %v1017_v0  ;;  %803 = vmatpush3.bf16.msra.mxu1 %v896_v7  ;;  %p932_p11 = pnand %p931_p8, %p1269_p10  ;;  %p938_p3 = scmp.lt.s32.totalorder %s936_s18, %s930_s20 }
  0x43   : > { %804 = vmatprep.subr.bf16.mxu1 %v1017_v0  ;;  %811 = vmatpush3.bf16.msra.mxu0 %v898_v9 }
  0x44   : > { %812 = vmatprep.subr.bf16.mxu0 %v1017_v0  ;;  %p933_p13 = pneg %p932_p11  ;;  %p939_p5 = por %p938_p3, %p937_p1 }
  0x46   : > { %805 = vmatpush3.bf16.msra.mxu1 %v897_v8  ;;  %p940_p6 = pnand %p939_p5, %p933_p13 }
  0x47   : > { %813 = vmatpush3.bf16.msra.mxu0 %v899_v10 }
  0x48   : > { %814 = vmatprep.subr.bf16.mxu0 %v1017_v0 }
  0x4b   : > { %815 = vmatpush3.bf16.msra.mxu0 %v900_v11 }
  0x4c   : > { %816 = vmatprep.subr.bf16.mxu0 %v1017_v0 }
  0x4f   : > { %817 = vmatpush3.bf16.msra.mxu0 %v901_v21 }
 0x114   : > { %v422_v13 = vpop.f32.mrb[0].mxu0 }
 0x115   : > { %v423_v14 = vadd.f32 %v757_v12, %v422_v13  ;;  %v796_v15 = vpop.f32.mrb[1].mxu0 }
 0x116   : > { %v425_v16 = vpop.f32.mrb[2].mxu0 }
 0x117   : > { %v428_v17 = vmax.f32 %v423_v14, 0.0  ;;  %v797_v18 = vpop.f32.mrb[3].mxu0 }
 0x119   : > { %v429_v19 = vpack.c.bf16 %v428_v17, %v428_v17 }
 0x11b   : > { %431 = vst.msk [vmem:[#allocation2] sm:$0xf] %vm430_vm2, %v429_v19 }
 0x122   : > { %v433_v20 = vld [vmem:[#allocation2] sm:$0xf] }
 0x123   : > { %807 = vmatmul.mubr.msk.bf16.vlgmr.msra.gmra.mrb[0].mxu1 %vm473_vm3, %v433_v20 }
 0x1f6   : > { %v511_v23 = vpop.f32.mrb[0].mxu1 }
 0x1f7   : > { %v512_v24 = vadd.f32 %v761_v22, %v511_v23  ;;  %v808_v25 = vpop.f32.mrb[1].mxu1 }
 0x1f8   : > { %v514_v26 = vpop.f32.mrb[2].mxu1 }
 0x1f9   : > { %v517_v27 = vpack.c.bf16 %v512_v24, %v512_v24  ;;  %v809_v28 = vpop.f32.mrb[3].mxu1 }
 0x1fb   : > { %819 = vmatmul.mubr.msk.bf16.vlgmr.msra.gmra.mrb[4].mxu0 %vm473_vm3, %v517_v27 }
 0x2ce   : > { %v588_v30 = vpop.f32.mrb[4].mxu0 }
 0x2cf   : > { %v594_v31 = vadd.f32 %v588_v30, %v518_v29  ;;  %v820_v32 = vpop.f32.mrb[5].mxu0 }
 0x2d0   : > { %v591_v33 = vpop.f32.mrb[6].mxu0 }
 0x2d1   : > { %596 = vst.msk [vmem:[#allocation3] sm:$0xff] %vm384_vm0, %v594_v31  ;;  %v821_v34 = vpop.f32.mrb[7].mxu0 }
 0x2d8   : > { %v600_v36 = vld [vmem:[#allocation3] sm:$0xff] }
 0x2d9   : > { %v608_v37 = vadd.f32 %v772_v35, %v600_v36 }
 0x2db   : > { %609 = vst.msk [vmem:[%s336_s16] sm:$0xff] %vm384_vm0, %v608_v37 }
 0x2dc   : > { %943 = shalt.err (!%p940_p6)
}
 0x2dd   : > { %s944_s23 = scalar_lea.hbm %s1202_s12, 128  ;;  %s948_s22 = scalar_lea.hbm %s1257_s7, 256 }
 0x2de   : > { %p945_p7 = scmp.ne.s32.totalorder %s1202_s12, %s944_s23  ;;  %p949_p0 = scmp.lt.u32.totalorder %s1202_s12, %s1257_s7 }
 0x2df   : > { %p950_p2 = scmp.lt.u32.totalorder %s948_s22, %s944_s23  ;;  %p952_p8 = scmp.lt.u32.totalorder %s944_s23, %s1202_s12 }
 0x2e0   : > { %p946_p9 = pnand %p945_p7, %p1269_p10 }
 0x2e1   : > { %p951_p4 = por %p950_p2, %p949_p0 }
 0x2e2   : > { %p947_p12 = pneg %p946_p9 }
 0x2e3   : > { %p953_p11 = por %p952_p8, %p951_p4 }
 0x2e5   : > { %p954_p13 = pnand %p953_p11, %p947_p12 }
 0x2e7   : > { %957 = shalt.err (!%p954_p13)
}
 0x2e8   : > { %826 = dma.vmem_to_hbm [thread:$0]  (%p1269_p10), %s1204_s30, 128, %s1202_s12, %s611_s17  }
 0x2e9 PF: > { %p838_p1 = scmp.ge.s32.totalorder %s1012_s29, 2  ;;  %s636_s10 = sand.u32 1, %s992_s24  }
 0x2ea   : > { %p1270_p3 = scmp.ne.s32.totalorder %s1263_s13, 0  ;;  %s637_s20 = scalar_lea.sflag [#allocation6], %s636_s10 }
 0x2ec   : > { %p833_p5 = pnand %p838_p1, %p1270_p3 }
 0x2ee   : > { %987 = dma.done.wait (!%p833_p5), %s637_s20, 128  }
 0x2ef   : > { %989 = vsyncadd (!%p833_p5), %s637_s20, 4294967168  ;;  %s21_s29 = sadd.s32 1, %s1012_s29   ;;  %s1271_s24 = smov %s996_s25 }
 0x2f0   : > { %p18_p6 = scmp.ge.s32.totalorder %s21_s29, 4   ;;  %s1272_s25 = smov %s1000_s26 }
 0x2f1   : > { %s1273_s26 = smov %s1113_s14  ;;  %s1274_s27 = smov %s1008_s28 }
 0x2f2   : > { %s1275_s28 = smov %s1277_s9  ;;  %20 = sbr.rel (!%p18_p6) target bundleno = 5 (0x5), region = 105 }
 0x2f9   :  { %642 = vsyncpa [#allocation5], 1 }
 0x2fa   :  { %644 = vsyncpa [#allocation5 + $0x1], 1 }
 0x2fb   :  { %645 = vsyncpa [#allocation6], 1 }
 0x2fc   :  { %647 = vsyncpa [#allocation6 + $0x1], 1 }

</bundles_post_ra>
